<compile_context>
chip_gen: v7x
topology: tpu7x:2x2x1
jax: 0.10.0
libtpu: 0.0.40
codegen_flags: <defaults>
</compile_context>

<pallas_src>
import functools

import numpy as np
import jax
import jax.numpy as jnp
from jax import lax
from jax.experimental import pallas as pl
from jax.experimental.pallas import tpu as pltpu


# ---------------------------------------------------------------------------
# Parameter init (PyTorch layouts) + dims
# ---------------------------------------------------------------------------
def init_params(key, input_dim, channels):
    c, h, w = input_dim
    co1, co2 = channels
    k1 = (h, 2)          # conv1 kernel (full height, 2 wide), stride 1
    k2 = (1, 4)          # conv2 kernel, stride 2
    w1_out = w - 1
    fc_w = int(np.floor((w - 1) / 2) - 1)
    f1 = co2 * 1 * fc_w
    f2 = f1 // 2
    f3 = f2 // 2

    keys = jax.random.split(key, 8)

    def u(k, shape, fan_in):
        bound = 1.0 / float(np.sqrt(fan_in))
        return jax.random.uniform(k, shape, jnp.float32, -bound, bound)

    params = dict(
        conv1_w=u(keys[0], (co1, c, k1[0], k1[1]), c * k1[0] * k1[1]),
        conv1_b=u(keys[1], (co1,), c * k1[0] * k1[1]),
        conv2_w=u(keys[2], (co2, co1, k2[0], k2[1]), co1 * k2[0] * k2[1]),
        conv2_b=u(keys[3], (co2,), co1 * k2[0] * k2[1]),
        fc1_w=u(keys[4], (f2, f1), f1),
        fc1_b=u(keys[5], (f2,), f1),
        fc2_w=u(keys[6], (f3, f2), f2),
        fc2_b=u(keys[7], (f3,), f2),
    )
    dims = dict(co1=co1, co2=co2, w1_out=w1_out, fc_w=fc_w, f1=f1, f2=f2, f3=f3)
    return params, dims


def pack_params(params, input_dim):
    """One-time repack of PyTorch-layout weights into kernel-friendly layouts."""
    c, h, w = input_dim
    conv1_w, conv2_w = params["conv1_w"], params["conv2_w"]
    co1, co2 = conv1_w.shape[0], conv2_w.shape[0]
    ch = c * h
    f2, f1 = params["fc1_w"].shape
    f3 = params["fc2_w"].shape[0]
    w2o = f1 // co2

    # conv1: rows [0:CH) = tap kw=0, rows [CH:2CH) = tap kw=1; cols = out chan.
    w1 = jnp.concatenate(
        [conv1_w[:, :, :, 0].reshape(co1, ch).T,
         conv1_w[:, :, :, 1].reshape(co1, ch).T], axis=0)              # (2CH, co1)
    # conv2: row index kw*co1 + c1, cols = out chan.
    w2 = jnp.transpose(conv2_w[:, :, 0, :], (2, 1, 0)).reshape(4 * co1, co2)
    # fc1 with torch's NCHW flatten (index o2*W2 + j) folded in:
    # row index j*co2 + o2, cols = hidden unit.
    w3 = jnp.transpose(params["fc1_w"].reshape(f2, co2, w2o),
                       (2, 1, 0)).reshape(w2o * co2, f2)               # (W2*co2, f2)
    w4 = params["fc2_w"].T                                             # (f2, f3)

    b1 = params["conv1_b"].reshape(1, co1)
    b2 = params["conv2_b"].reshape(1, co2)
    b3 = params["fc1_b"].reshape(1, f2)
    b4 = params["fc2_b"].reshape(1, f3)
    return (w1, b1, w2, b2, w3, b3, w4, b4)


# ---------------------------------------------------------------------------
# Fused forward: single pallas_call
# ---------------------------------------------------------------------------
def conv_encoder_forward(x, packed, dims):
    n, c, h, w = x.shape
    ch = c * h
    co1, co2 = dims["co1"], dims["co2"]
    w1o, w2o = dims["w1_out"], dims["fc_w"]
    f2, f3 = dims["f2"], dims["f3"]

    # batch tile per grid step (8 keeps blocks (8,...)-aligned at large batch)
    tb = n if n <= 8 else 8
    if n % tb:
        raise ValueError("batch must be <= 8 or a multiple of 8")

    # Layout-only prep: (N,C,H,W) -> (N, W, C*H) so the conv window axis is the
    # sublane axis inside the kernel (one tiny XLA op on the input; everything
    # downstream stays in VMEM).
    xw = jnp.transpose(x, (0, 3, 1, 2)).reshape(n, w, ch)

    w1, b1, w2, b2, w3, b3, w4, b4 = packed

    def kernel(x_ref, w1_ref, b1_ref, w2_ref, b2_ref, w3_ref, b3_ref,
               w4_ref, b4_ref, o_ref, a1_scr, a2_scr):
        # ---- conv1 + conv2 per sample of the batch tile (VMEM resident) ----
        for s in range(tb):
            xs = x_ref[s]                                        # (W, C*H)
            a1 = jnp.dot(xs[0:w1o, :], w1_ref[0:ch, :],
                         preferred_element_type=jnp.float32)
            a1 = a1 + jnp.dot(xs[1:w1o + 1, :], w1_ref[ch:2 * ch, :],
                              preferred_element_type=jnp.float32)
            a1 = jnp.maximum(a1 + b1_ref[...], 0.0)              # (W1, co1)
            a1_scr[...] = a1

            # conv2: kernel (1,4), stride 2  ->  stride-2 sublane windows
            a2 = None
            for kw in range(4):
                tap = a1_scr[pl.ds(kw, w2o, stride=2), :]        # (W2, co1)
                term = jnp.dot(tap, w2_ref[pl.ds(kw * co1, co1), :],
                               preferred_element_type=jnp.float32)
                a2 = term if a2 is None else a2 + term
            a2 = jnp.maximum(a2 + b2_ref[...], 0.0)              # (W2, co2)
            a2_scr[pl.ds(s * w2o, w2o), :] = a2

        # ---- flatten + fc1 (folded as a sum over the W2 positions) + fc2 ----
        h1 = None
        for j in range(w2o):
            aj = a2_scr[pl.ds(j, tb, stride=w2o), :]             # (TB, co2)
            term = jnp.dot(aj, w3_ref[pl.ds(j * co2, co2), :],
                           preferred_element_type=jnp.float32)
            h1 = term if h1 is None else h1 + term
        h1 = jnp.maximum(h1 + b3_ref[...], 0.0)                  # (TB, f2)
        h2 = jnp.dot(h1, w4_ref[...], preferred_element_type=jnp.float32)
        o_ref[...] = jnp.maximum(h2 + b4_ref[...], 0.0)          # (TB, f3)

    flops = 2 * n * (w1o * 2 * ch * co1 + w2o * 4 * co1 * co2
                     + w2o * co2 * f2 + f2 * f3)
    bytes_accessed = 4 * (xw.size + w1.size + b1.size + w2.size + b2.size
                          + w3.size + b3.size + w4.size + b4.size + n * f3)

    return pl.pallas_call(
        kernel,
        grid=(n // tb,),
        in_specs=[
            pl.BlockSpec((tb, w, ch), lambda i: (i, 0, 0)),      # x (batch-tiled)
            pl.BlockSpec((2 * ch, co1), lambda i: (0, 0)),       # conv1 weight
            pl.BlockSpec((1, co1), lambda i: (0, 0)),            # conv1 bias
            pl.BlockSpec((4 * co1, co2), lambda i: (0, 0)),      # conv2 weight
            pl.BlockSpec((1, co2), lambda i: (0, 0)),            # conv2 bias
            pl.BlockSpec((w2o * co2, f2), lambda i: (0, 0)),     # fc1 weight
            pl.BlockSpec((1, f2), lambda i: (0, 0)),             # fc1 bias
            pl.BlockSpec((f2, f3), lambda i: (0, 0)),            # fc2 weight
            pl.BlockSpec((1, f3), lambda i: (0, 0)),             # fc2 bias
        ],
        out_specs=pl.BlockSpec((tb, f3), lambda i: (i, 0)),
        out_shape=jax.ShapeDtypeStruct((n, f3), jnp.float32),
        scratch_shapes=[
            pltpu.VMEM((w1o, co1), jnp.float32),                 # conv1 activation
            pltpu.VMEM((tb * w2o, co2), jnp.float32),            # conv2 activation
        ],
        compiler_params=pltpu.CompilerParams(
            dimension_semantics=("parallel",)),
        cost_estimate=pl.CostEstimate(
            flops=flops, transcendentals=0, bytes_accessed=bytes_accessed),
    )(xw, w1, b1, w2, b2, w3, b3, w4, b4)


# ---------------------------------------------------------------------------
# Pure-JAX reference (correctness check only)
# ---------------------------------------------------------------------------
def reference_forward(x, params):
    a1 = lax.conv_general_dilated(x, params["conv1_w"], (1, 1), "VALID",
                                  dimension_numbers=("NCHW", "OIHW", "NCHW"))
    a1 = jax.nn.relu(a1 + params["conv1_b"][None, :, None, None])
    a2 = lax.conv_general_dilated(a1, params["conv2_w"], (2, 2), "VALID",
                                  dimension_numbers=("NCHW", "OIHW", "NCHW"))
    a2 = jax.nn.relu(a2 + params["conv2_b"][None, :, None, None])
    flat = a2.reshape(a2.shape[0], -1)
    h1 = jax.nn.relu(flat @ params["fc1_w"].T + params["fc1_b"])
    return jax.nn.relu(h1 @ params["fc2_w"].T + params["fc2_b"])


if __name__ == "__main__":
    key = jax.random.PRNGKey(0)
    k_x, k_p = jax.random.split(key)

    # small shapes consistent with the module: input_dim=(C,H,W), channels
    input_dim = (4, 8, 16)   # C=4, H=8, W=16
    channels = (8, 16)
    batch = 2

    x = jax.random.normal(k_x, (batch,) + input_dim, dtype=jnp.float32)
    params, dims = init_params(k_p, input_dim, channels)
    packed = pack_params(params, input_dim)   # one-time weight repack

    fwd = jax.jit(functools.partial(conv_encoder_forward, packed=packed, dims=dims))
    out = jax.block_until_ready(fwd(x))

    ref = reference_forward(x, params)
    assert out.shape == (batch, dims["f3"]), (out.shape, dims["f3"])
    if not np.allclose(np.asarray(out), np.asarray(ref), atol=1e-4, rtol=1e-4):
        raise AssertionError("Pallas ConvEncoder output mismatch vs JAX reference")

    print("KERNEL_OK")
</pallas_src>

<mosaic_0001>
module attributes {stable_mosaic.version = 11 : i64} {
  func.func @kernel(%arg0: i32, %arg1: memref<2x16x32xf32, #tpu.memory_space<vmem>>, %arg2: memref<64x8xf32, #tpu.memory_space<vmem>>, %arg3: memref<1x8xf32, #tpu.memory_space<vmem>>, %arg4: memref<32x16xf32, #tpu.memory_space<vmem>>, %arg5: memref<1x16xf32, #tpu.memory_space<vmem>>, %arg6: memref<96x48xf32, #tpu.memory_space<vmem>>, %arg7: memref<1x48xf32, #tpu.memory_space<vmem>>, %arg8: memref<48x24xf32, #tpu.memory_space<vmem>>, %arg9: memref<1x24xf32, #tpu.memory_space<vmem>>, %arg10: memref<2x24xf32, #tpu.memory_space<vmem>>, %arg11: memref<15x8xf32, #tpu.memory_space<vmem>>, %arg12: memref<12x16xf32, #tpu.memory_space<vmem>>) attributes {dimension_semantics = [#tpu.dimension_semantics<parallel>], iteration_bounds = array<i64: 1>, scalar_prefetch = 0 : i64, scratch_operands = 2 : i64, tpu.core_type = #tpu.core_type<tc>, window_params = [{transform_indices = @transform_0, window_bounds = array<i64: 2, 16, 32>}, {pipeline_mode = #tpu.pipeline_mode<synchronous>, transform_indices = @transform_1, window_bounds = array<i64: 64, 8>}, {pipeline_mode = #tpu.pipeline_mode<synchronous>, transform_indices = @transform_2, window_bounds = array<i64: 1, 8>}, {pipeline_mode = #tpu.pipeline_mode<synchronous>, transform_indices = @transform_3, window_bounds = array<i64: 32, 16>}, {pipeline_mode = #tpu.pipeline_mode<synchronous>, transform_indices = @transform_4, window_bounds = array<i64: 1, 16>}, {pipeline_mode = #tpu.pipeline_mode<synchronous>, transform_indices = @transform_5, window_bounds = array<i64: 96, 48>}, {pipeline_mode = #tpu.pipeline_mode<synchronous>, transform_indices = @transform_6, window_bounds = array<i64: 1, 48>}, {pipeline_mode = #tpu.pipeline_mode<synchronous>, transform_indices = @transform_7, window_bounds = array<i64: 48, 24>}, {pipeline_mode = #tpu.pipeline_mode<synchronous>, transform_indices = @transform_8, window_bounds = array<i64: 1, 24>}, {transform_indices = @transform_9, window_bounds = array<i64: 2, 24>}]} {
    %c0 = arith.constant 0 : index
    %c0_0 = arith.constant 0 : index
    %c0_1 = arith.constant 0 : index
    %0 = vector.load %arg1[%c0, %c0_0, %c0_1] : memref<2x16x32xf32, #tpu.memory_space<vmem>>, vector<1x16x32xf32>
    %1 = vector.shape_cast %0 : vector<1x16x32xf32> to vector<16x32xf32>
    %2 = vector.extract_strided_slice %1 {offsets = [0, 0], sizes = [15, 32], strides = [1, 1]} : vector<16x32xf32> to vector<15x32xf32>
    %c0_2 = arith.constant 0 : index
    %c0_3 = arith.constant 0 : index
    %3 = vector.load %arg2[%c0_2, %c0_3] : memref<64x8xf32, #tpu.memory_space<vmem>>, vector<32x8xf32>
    %cst = arith.constant dense<0.000000e+00> : vector<15x8xf32>
    %4 = tpu.matmul %2, %3, %cst {dimension_numbers = #tpu.dot_dimension_numbers<[1], [0], [0], [1], [0, 0, 1, 1], [], []>} : vector<15x32xf32>, vector<32x8xf32>, vector<15x8xf32> -> vector<15x8xf32>
    %5 = vector.extract_strided_slice %1 {offsets = [1, 0], sizes = [15, 32], strides = [1, 1]} : vector<16x32xf32> to vector<15x32xf32>
    %c32 = arith.constant 32 : index
    %c0_4 = arith.constant 0 : index
    %6 = vector.load %arg2[%c32, %c0_4] : memref<64x8xf32, #tpu.memory_space<vmem>>, vector<32x8xf32>
    %cst_5 = arith.constant dense<0.000000e+00> : vector<15x8xf32>
    %7 = tpu.matmul %5, %6, %cst_5 {dimension_numbers = #tpu.dot_dimension_numbers<[1], [0], [0], [1], [0, 0, 1, 1], [], []>} : vector<15x32xf32>, vector<32x8xf32>, vector<15x8xf32> -> vector<15x8xf32>
    %8 = arith.addf %4, %7 : vector<15x8xf32>
    %c0_6 = arith.constant 0 : index
    %c0_7 = arith.constant 0 : index
    %9 = vector.load %arg3[%c0_6, %c0_7] : memref<1x8xf32, #tpu.memory_space<vmem>>, vector<1x8xf32>
    %10 = vector.broadcast %9 : vector<1x8xf32> to vector<15x8xf32>
    %11 = arith.addf %8, %10 : vector<15x8xf32>
    %cst_8 = arith.constant 0.000000e+00 : f32
    %12 = vector.broadcast %cst_8 : f32 to vector<15x8xf32>
    %13 = arith.maximumf %11, %12 : vector<15x8xf32>
    %c0_9 = arith.constant 0 : index
    %c0_10 = arith.constant 0 : index
    %14 = vector.load %arg11[%c0_9, %c0_10] : memref<15x8xf32, #tpu.memory_space<vmem>>, vector<15x8xf32>
    tpu.vector_store %arg11[%c0_9, %c0_10], %13 {strides = array<i32>} : memref<15x8xf32, #tpu.memory_space<vmem>>, vector<15x8xf32>,
    %c0_11 = arith.constant 0 : index
    %c0_12 = arith.constant 0 : index
    %15 = tpu.strided_load %arg11[%c0_11, %c0_12] {strides = array<i32: 2, 1>} : memref<15x8xf32, #tpu.memory_space<vmem>>, vector<6x8xf32>
    %c0_13 = arith.constant 0 : index
    %c0_14 = arith.constant 0 : index
    %16 = vector.load %arg4[%c0_13, %c0_14] : memref<32x16xf32, #tpu.memory_space<vmem>>, vector<8x16xf32>
    %cst_15 = arith.constant dense<0.000000e+00> : vector<6x16xf32>
    %17 = tpu.matmul %15, %16, %cst_15 {dimension_numbers = #tpu.dot_dimension_numbers<[1], [0], [0], [1], [0, 0, 1, 1], [], []>} : vector<6x8xf32>, vector<8x16xf32>, vector<6x16xf32> -> vector<6x16xf32>
    %c1 = arith.constant 1 : index
    %c0_16 = arith.constant 0 : index
    %18 = tpu.strided_load %arg11[%c1, %c0_16] {strides = array<i32: 2, 1>} : memref<15x8xf32, #tpu.memory_space<vmem>>, vector<6x8xf32>
    %c8 = arith.constant 8 : index
    %c0_17 = arith.constant 0 : index
    %19 = vector.load %arg4[%c8, %c0_17] : memref<32x16xf32, #tpu.memory_space<vmem>>, vector<8x16xf32>
    %cst_18 = arith.constant dense<0.000000e+00> : vector<6x16xf32>
    %20 = tpu.matmul %18, %19, %cst_18 {dimension_numbers = #tpu.dot_dimension_numbers<[1], [0], [0], [1], [0, 0, 1, 1], [], []>} : vector<6x8xf32>, vector<8x16xf32>, vector<6x16xf32> -> vector<6x16xf32>
    %21 = arith.addf %17, %20 : vector<6x16xf32>
    %c2 = arith.constant 2 : index
    %c0_19 = arith.constant 0 : index
    %22 = tpu.strided_load %arg11[%c2, %c0_19] {strides = array<i32: 2, 1>} : memref<15x8xf32, #tpu.memory_space<vmem>>, vector<6x8xf32>
    %c16 = arith.constant 16 : index
    %c0_20 = arith.constant 0 : index
    %23 = vector.load %arg4[%c16, %c0_20] : memref<32x16xf32, #tpu.memory_space<vmem>>, vector<8x16xf32>
    %cst_21 = arith.constant dense<0.000000e+00> : vector<6x16xf32>
    %24 = tpu.matmul %22, %23, %cst_21 {dimension_numbers = #tpu.dot_dimension_numbers<[1], [0], [0], [1], [0, 0, 1, 1], [], []>} : vector<6x8xf32>, vector<8x16xf32>, vector<6x16xf32> -> vector<6x16xf32>
    %25 = arith.addf %21, %24 : vector<6x16xf32>
    %c3 = arith.constant 3 : index
    %c0_22 = arith.constant 0 : index
    %26 = tpu.strided_load %arg11[%c3, %c0_22] {strides = array<i32: 2, 1>} : memref<15x8xf32, #tpu.memory_space<vmem>>, vector<6x8xf32>
    %c24 = arith.constant 24 : index
    %c0_23 = arith.constant 0 : index
    %27 = vector.load %arg4[%c24, %c0_23] : memref<32x16xf32, #tpu.memory_space<vmem>>, vector<8x16xf32>
    %cst_24 = arith.constant dense<0.000000e+00> : vector<6x16xf32>
    %28 = tpu.matmul %26, %27, %cst_24 {dimension_numbers = #tpu.dot_dimension_numbers<[1], [0], [0], [1], [0, 0, 1, 1], [], []>} : vector<6x8xf32>, vector<8x16xf32>, vector<6x16xf32> -> vector<6x16xf32>
    %29 = arith.addf %25, %28 : vector<6x16xf32>
    %c0_25 = arith.constant 0 : index
    %c0_26 = arith.constant 0 : index
    %30 = vector.load %arg5[%c0_25, %c0_26] : memref<1x16xf32, #tpu.memory_space<vmem>>, vector<1x16xf32>
    %31 = vector.broadcast %30 : vector<1x16xf32> to vector<6x16xf32>
    %32 = arith.addf %29, %31 : vector<6x16xf32>
    %cst_27 = arith.constant 0.000000e+00 : f32
    %33 = vector.broadcast %cst_27 : f32 to vector<6x16xf32>
    %34 = arith.maximumf %32, %33 : vector<6x16xf32>
    %c0_28 = arith.constant 0 : index
    %c0_29 = arith.constant 0 : index
    %35 = vector.load %arg12[%c0_28, %c0_29] : memref<12x16xf32, #tpu.memory_space<vmem>>, vector<6x16xf32>
    tpu.vector_store %arg12[%c0_28, %c0_29], %34 {strides = array<i32>} : memref<12x16xf32, #tpu.memory_space<vmem>>, vector<6x16xf32>,
    %c1_30 = arith.constant 1 : index
    %c0_31 = arith.constant 0 : index
    %c0_32 = arith.constant 0 : index
    %36 = vector.load %arg1[%c1_30, %c0_31, %c0_32] : memref<2x16x32xf32, #tpu.memory_space<vmem>>, vector<1x16x32xf32>
    %37 = vector.shape_cast %36 : vector<1x16x32xf32> to vector<16x32xf32>
    %38 = vector.extract_strided_slice %37 {offsets = [0, 0], sizes = [15, 32], strides = [1, 1]} : vector<16x32xf32> to vector<15x32xf32>
    %c0_33 = arith.constant 0 : index
    %c0_34 = arith.constant 0 : index
    %39 = vector.load %arg2[%c0_33, %c0_34] : memref<64x8xf32, #tpu.memory_space<vmem>>, vector<32x8xf32>
    %cst_35 = arith.constant dense<0.000000e+00> : vector<15x8xf32>
    %40 = tpu.matmul %38, %39, %cst_35 {dimension_numbers = #tpu.dot_dimension_numbers<[1], [0], [0], [1], [0, 0, 1, 1], [], []>} : vector<15x32xf32>, vector<32x8xf32>, vector<15x8xf32> -> vector<15x8xf32>
    %41 = vector.extract_strided_slice %37 {offsets = [1, 0], sizes = [15, 32], strides = [1, 1]} : vector<16x32xf32> to vector<15x32xf32>
    %c32_36 = arith.constant 32 : index
    %c0_37 = arith.constant 0 : index
    %42 = vector.load %arg2[%c32_36, %c0_37] : memref<64x8xf32, #tpu.memory_space<vmem>>, vector<32x8xf32>
    %cst_38 = arith.constant dense<0.000000e+00> : vector<15x8xf32>
    %43 = tpu.matmul %41, %42, %cst_38 {dimension_numbers = #tpu.dot_dimension_numbers<[1], [0], [0], [1], [0, 0, 1, 1], [], []>} : vector<15x32xf32>, vector<32x8xf32>, vector<15x8xf32> -> vector<15x8xf32>
    %44 = arith.addf %40, %43 : vector<15x8xf32>
    %c0_39 = arith.constant 0 : index
    %c0_40 = arith.constant 0 : index
    %45 = vector.load %arg3[%c0_39, %c0_40] : memref<1x8xf32, #tpu.memory_space<vmem>>, vector<1x8xf32>
    %46 = vector.broadcast %45 : vector<1x8xf32> to vector<15x8xf32>
    %47 = arith.addf %44, %46 : vector<15x8xf32>
    %cst_41 = arith.constant 0.000000e+00 : f32
    %48 = vector.broadcast %cst_41 : f32 to vector<15x8xf32>
    %49 = arith.maximumf %47, %48 : vector<15x8xf32>
    %c0_42 = arith.constant 0 : index
    %c0_43 = arith.constant 0 : index
    %50 = vector.load %arg11[%c0_42, %c0_43] : memref<15x8xf32, #tpu.memory_space<vmem>>, vector<15x8xf32>
    tpu.vector_store %arg11[%c0_42, %c0_43], %49 {strides = array<i32>} : memref<15x8xf32, #tpu.memory_space<vmem>>, vector<15x8xf32>,
    %c0_44 = arith.constant 0 : index
    %c0_45 = arith.constant 0 : index
    %51 = tpu.strided_load %arg11[%c0_44, %c0_45] {strides = array<i32: 2, 1>} : memref<15x8xf32, #tpu.memory_space<vmem>>, vector<6x8xf32>
    %c0_46 = arith.constant 0 : index
    %c0_47 = arith.constant 0 : index
    %52 = vector.load %arg4[%c0_46, %c0_47] : memref<32x16xf32, #tpu.memory_space<vmem>>, vector<8x16xf32>
    %cst_48 = arith.constant dense<0.000000e+00> : vector<6x16xf32>
    %53 = tpu.matmul %51, %52, %cst_48 {dimension_numbers = #tpu.dot_dimension_numbers<[1], [0], [0], [1], [0, 0, 1, 1], [], []>} : vector<6x8xf32>, vector<8x16xf32>, vector<6x16xf32> -> vector<6x16xf32>
    %c1_49 = arith.constant 1 : index
    %c0_50 = arith.constant 0 : index
    %54 = tpu.strided_load %arg11[%c1_49, %c0_50] {strides = array<i32: 2, 1>} : memref<15x8xf32, #tpu.memory_space<vmem>>, vector<6x8xf32>
    %c8_51 = arith.constant 8 : index
    %c0_52 = arith.constant 0 : index
    %55 = vector.load %arg4[%c8_51, %c0_52] : memref<32x16xf32, #tpu.memory_space<vmem>>, vector<8x16xf32>
    %cst_53 = arith.constant dense<0.000000e+00> : vector<6x16xf32>
    %56 = tpu.matmul %54, %55, %cst_53 {dimension_numbers = #tpu.dot_dimension_numbers<[1], [0], [0], [1], [0, 0, 1, 1], [], []>} : vector<6x8xf32>, vector<8x16xf32>, vector<6x16xf32> -> vector<6x16xf32>
    %57 = arith.addf %53, %56 : vector<6x16xf32>
    %c2_54 = arith.constant 2 : index
    %c0_55 = arith.constant 0 : index
    %58 = tpu.strided_load %arg11[%c2_54, %c0_55] {strides = array<i32: 2, 1>} : memref<15x8xf32, #tpu.memory_space<vmem>>, vector<6x8xf32>
    %c16_56 = arith.constant 16 : index
    %c0_57 = arith.constant 0 : index
    %59 = vector.load %arg4[%c16_56, %c0_57] : memref<32x16xf32, #tpu.memory_space<vmem>>, vector<8x16xf32>
    %cst_58 = arith.constant dense<0.000000e+00> : vector<6x16xf32>
    %60 = tpu.matmul %58, %59, %cst_58 {dimension_numbers = #tpu.dot_dimension_numbers<[1], [0], [0], [1], [0, 0, 1, 1], [], []>} : vector<6x8xf32>, vector<8x16xf32>, vector<6x16xf32> -> vector<6x16xf32>
    %61 = arith.addf %57, %60 : vector<6x16xf32>
    %c3_59 = arith.constant 3 : index
    %c0_60 = arith.constant 0 : index
    %62 = tpu.strided_load %arg11[%c3_59, %c0_60] {strides = array<i32: 2, 1>} : memref<15x8xf32, #tpu.memory_space<vmem>>, vector<6x8xf32>
    %c24_61 = arith.constant 24 : index
    %c0_62 = arith.constant 0 : index
    %63 = vector.load %arg4[%c24_61, %c0_62] : memref<32x16xf32, #tpu.memory_space<vmem>>, vector<8x16xf32>
    %cst_63 = arith.constant dense<0.000000e+00> : vector<6x16xf32>
    %64 = tpu.matmul %62, %63, %cst_63 {dimension_numbers = #tpu.dot_dimension_numbers<[1], [0], [0], [1], [0, 0, 1, 1], [], []>} : vector<6x8xf32>, vector<8x16xf32>, vector<6x16xf32> -> vector<6x16xf32>
    %65 = arith.addf %61, %64 : vector<6x16xf32>
    %c0_64 = arith.constant 0 : index
    %c0_65 = arith.constant 0 : index
    %66 = vector.load %arg5[%c0_64, %c0_65] : memref<1x16xf32, #tpu.memory_space<vmem>>, vector<1x16xf32>
    %67 = vector.broadcast %66 : vector<1x16xf32> to vector<6x16xf32>
    %68 = arith.addf %65, %67 : vector<6x16xf32>
    %cst_66 = arith.constant 0.000000e+00 : f32
    %69 = vector.broadcast %cst_66 : f32 to vector<6x16xf32>
    %70 = arith.maximumf %68, %69 : vector<6x16xf32>
    %c6 = arith.constant 6 : index
    %c0_67 = arith.constant 0 : index
    %71 = vector.load %arg12[%c6, %c0_67] : memref<12x16xf32, #tpu.memory_space<vmem>>, vector<6x16xf32>
    tpu.vector_store %arg12[%c6, %c0_67], %70 {strides = array<i32>} : memref<12x16xf32, #tpu.memory_space<vmem>>, vector<6x16xf32>,
    %c0_68 = arith.constant 0 : index
    %c0_69 = arith.constant 0 : index
    %72 = tpu.strided_load %arg12[%c0_68, %c0_69] {strides = array<i32: 6, 1>} : memref<12x16xf32, #tpu.memory_space<vmem>>, vector<2x16xf32>
    %c0_70 = arith.constant 0 : index
    %c0_71 = arith.constant 0 : index
    %73 = vector.load %arg6[%c0_70, %c0_71] : memref<96x48xf32, #tpu.memory_space<vmem>>, vector<16x48xf32>
    %cst_72 = arith.constant dense<0.000000e+00> : vector<2x48xf32>
    %74 = tpu.matmul %72, %73, %cst_72 {dimension_numbers = #tpu.dot_dimension_numbers<[1], [0], [0], [1], [0, 0, 1, 1], [], []>} : vector<2x16xf32>, vector<16x48xf32>, vector<2x48xf32> -> vector<2x48xf32>
    %c1_73 = arith.constant 1 : index
    %c0_74 = arith.constant 0 : index
    %75 = tpu.strided_load %arg12[%c1_73, %c0_74] {strides = array<i32: 6, 1>} : memref<12x16xf32, #tpu.memory_space<vmem>>, vector<2x16xf32>
    %c16_75 = arith.constant 16 : index
    %c0_76 = arith.constant 0 : index
    %76 = vector.load %arg6[%c16_75, %c0_76] : memref<96x48xf32, #tpu.memory_space<vmem>>, vector<16x48xf32>
    %cst_77 = arith.constant dense<0.000000e+00> : vector<2x48xf32>
    %77 = tpu.matmul %75, %76, %cst_77 {dimension_numbers = #tpu.dot_dimension_numbers<[1], [0], [0], [1], [0, 0, 1, 1], [], []>} : vector<2x16xf32>, vector<16x48xf32>, vector<2x48xf32> -> vector<2x48xf32>
    %78 = arith.addf %74, %77 : vector<2x48xf32>
    %c2_78 = arith.constant 2 : index
    %c0_79 = arith.constant 0 : index
    %79 = tpu.strided_load %arg12[%c2_78, %c0_79] {strides = array<i32: 6, 1>} : memref<12x16xf32, #tpu.memory_space<vmem>>, vector<2x16xf32>
    %c32_80 = arith.constant 32 : index
    %c0_81 = arith.constant 0 : index
    %80 = vector.load %arg6[%c32_80, %c0_81] : memref<96x48xf32, #tpu.memory_space<vmem>>, vector<16x48xf32>
    %cst_82 = arith.constant dense<0.000000e+00> : vector<2x48xf32>
    %81 = tpu.matmul %79, %80, %cst_82 {dimension_numbers = #tpu.dot_dimension_numbers<[1], [0], [0], [1], [0, 0, 1, 1], [], []>} : vector<2x16xf32>, vector<16x48xf32>, vector<2x48xf32> -> vector<2x48xf32>
    %82 = arith.addf %78, %81 : vector<2x48xf32>
    %c3_83 = arith.constant 3 : index
    %c0_84 = arith.constant 0 : index
    %83 = tpu.strided_load %arg12[%c3_83, %c0_84] {strides = array<i32: 6, 1>} : memref<12x16xf32, #tpu.memory_space<vmem>>, vector<2x16xf32>
    %c48 = arith.constant 48 : index
    %c0_85 = arith.constant 0 : index
    %84 = vector.load %arg6[%c48, %c0_85] : memref<96x48xf32, #tpu.memory_space<vmem>>, vector<16x48xf32>
    %cst_86 = arith.constant dense<0.000000e+00> : vector<2x48xf32>
    %85 = tpu.matmul %83, %84, %cst_86 {dimension_numbers = #tpu.dot_dimension_numbers<[1], [0], [0], [1], [0, 0, 1, 1], [], []>} : vector<2x16xf32>, vector<16x48xf32>, vector<2x48xf32> -> vector<2x48xf32>
    %86 = arith.addf %82, %85 : vector<2x48xf32>
    %c4 = arith.constant 4 : index
    %c0_87 = arith.constant 0 : index
    %87 = tpu.strided_load %arg12[%c4, %c0_87] {strides = array<i32: 6, 1>} : memref<12x16xf32, #tpu.memory_space<vmem>>, vector<2x16xf32>
    %c64 = arith.constant 64 : index
    %c0_88 = arith.constant 0 : index
    %88 = vector.load %arg6[%c64, %c0_88] : memref<96x48xf32, #tpu.memory_space<vmem>>, vector<16x48xf32>
    %cst_89 = arith.constant dense<0.000000e+00> : vector<2x48xf32>
    %89 = tpu.matmul %87, %88, %cst_89 {dimension_numbers = #tpu.dot_dimension_numbers<[1], [0], [0], [1], [0, 0, 1, 1], [], []>} : vector<2x16xf32>, vector<16x48xf32>, vector<2x48xf32> -> vector<2x48xf32>
    %90 = arith.addf %86, %89 : vector<2x48xf32>
    %c5 = arith.constant 5 : index
    %c0_90 = arith.constant 0 : index
    %91 = tpu.strided_load %arg12[%c5, %c0_90] {strides = array<i32: 6, 1>} : memref<12x16xf32, #tpu.memory_space<vmem>>, vector<2x16xf32>
    %c80 = arith.constant 80 : index
    %c0_91 = arith.constant 0 : index
    %92 = vector.load %arg6[%c80, %c0_91] : memref<96x48xf32, #tpu.memory_space<vmem>>, vector<16x48xf32>
    %cst_92 = arith.constant dense<0.000000e+00> : vector<2x48xf32>
    %93 = tpu.matmul %91, %92, %cst_92 {dimension_numbers = #tpu.dot_dimension_numbers<[1], [0], [0], [1], [0, 0, 1, 1], [], []>} : vector<2x16xf32>, vector<16x48xf32>, vector<2x48xf32> -> vector<2x48xf32>
    %94 = arith.addf %90, %93 : vector<2x48xf32>
    %c0_93 = arith.constant 0 : index
    %c0_94 = arith.constant 0 : index
    %95 = vector.load %arg7[%c0_93, %c0_94] : memref<1x48xf32, #tpu.memory_space<vmem>>, vector<1x48xf32>
    %96 = vector.broadcast %95 : vector<1x48xf32> to vector<2x48xf32>
    %97 = arith.addf %94, %96 : vector<2x48xf32>
    %cst_95 = arith.constant 0.000000e+00 : f32
    %98 = vector.broadcast %cst_95 : f32 to vector<2x48xf32>
    %99 = arith.maximumf %97, %98 : vector<2x48xf32>
    %c0_96 = arith.constant 0 : index
    %c0_97 = arith.constant 0 : index
    %100 = vector.load %arg8[%c0_96, %c0_97] : memref<48x24xf32, #tpu.memory_space<vmem>>, vector<48x24xf32>
    %cst_98 = arith.constant dense<0.000000e+00> : vector<2x24xf32>
    %101 = tpu.matmul %99, %100, %cst_98 {dimension_numbers = #tpu.dot_dimension_numbers<[1], [0], [0], [1], [0, 0, 1, 1], [], []>} : vector<2x48xf32>, vector<48x24xf32>, vector<2x24xf32> -> vector<2x24xf32>
    %c0_99 = arith.constant 0 : index
    %c0_100 = arith.constant 0 : index
    %102 = vector.load %arg9[%c0_99, %c0_100] : memref<1x24xf32, #tpu.memory_space<vmem>>, vector<1x24xf32>
    %103 = vector.broadcast %102 : vector<1x24xf32> to vector<2x24xf32>
    %104 = arith.addf %101, %103 : vector<2x24xf32>
    %cst_101 = arith.constant 0.000000e+00 : f32
    %105 = vector.broadcast %cst_101 : f32 to vector<2x24xf32>
    %106 = arith.maximumf %104, %105 : vector<2x24xf32>
    %c0_102 = arith.constant 0 : index
    %c0_103 = arith.constant 0 : index
    %107 = vector.load %arg10[%c0_102, %c0_103] : memref<2x24xf32, #tpu.memory_space<vmem>>, vector<2x24xf32>
    tpu.vector_store %arg10[%c0_102, %c0_103], %106 {strides = array<i32>} : memref<2x24xf32, #tpu.memory_space<vmem>>, vector<2x24xf32>,
    return
  }
  func.func @transform_0(%arg0: i32) -> (i32, i32, i32) {
    %c0_i32 = arith.constant 0 : i32
    %c0_i32_0 = arith.constant 0 : i32
    %c0_i32_1 = arith.constant 0 : i32
    return %arg0, %c0_i32, %c0_i32_0 : i32, i32, i32
  }
  func.func @transform_1(%arg0: i32) -> (i32, i32) {
    %c0_i32 = arith.constant 0 : i32
    %c0_i32_0 = arith.constant 0 : i32
    %c0_i32_1 = arith.constant 0 : i32
    return %c0_i32, %c0_i32_0 : i32, i32
  }
  func.func @transform_2(%arg0: i32) -> (i32, i32) {
    %c0_i32 = arith.constant 0 : i32
    %c0_i32_0 = arith.constant 0 : i32
    %c0_i32_1 = arith.constant 0 : i32
    return %c0_i32, %c0_i32_0 : i32, i32
  }
  func.func @transform_3(%arg0: i32) -> (i32, i32) {
    %c0_i32 = arith.constant 0 : i32
    %c0_i32_0 = arith.constant 0 : i32
    %c0_i32_1 = arith.constant 0 : i32
    return %c0_i32, %c0_i32_0 : i32, i32
  }
  func.func @transform_4(%arg0: i32) -> (i32, i32) {
    %c0_i32 = arith.constant 0 : i32
    %c0_i32_0 = arith.constant 0 : i32
    %c0_i32_1 = arith.constant 0 : i32
    return %c0_i32, %c0_i32_0 : i32, i32
  }
  func.func @transform_5(%arg0: i32) -> (i32, i32) {
    %c0_i32 = arith.constant 0 : i32
    %c0_i32_0 = arith.constant 0 : i32
    %c0_i32_1 = arith.constant 0 : i32
    return %c0_i32, %c0_i32_0 : i32, i32
  }
  func.func @transform_6(%arg0: i32) -> (i32, i32) {
    %c0_i32 = arith.constant 0 : i32
    %c0_i32_0 = arith.constant 0 : i32
    %c0_i32_1 = arith.constant 0 : i32
    return %c0_i32, %c0_i32_0 : i32, i32
  }
  func.func @transform_7(%arg0: i32) -> (i32, i32) {
    %c0_i32 = arith.constant 0 : i32
    %c0_i32_0 = arith.constant 0 : i32
    %c0_i32_1 = arith.constant 0 : i32
    return %c0_i32, %c0_i32_0 : i32, i32
  }
  func.func @transform_8(%arg0: i32) -> (i32, i32) {
    %c0_i32 = arith.constant 0 : i32
    %c0_i32_0 = arith.constant 0 : i32
    %c0_i32_1 = arith.constant 0 : i32
    return %c0_i32, %c0_i32_0 : i32, i32
  }
  func.func @transform_9(%arg0: i32) -> (i32, i32) {
    %c0_i32 = arith.constant 0 : i32
    %c0_i32_0 = arith.constant 0 : i32
    return %arg0, %c0_i32 : i32, i32
  }
}

</mosaic_0001>

<bundles_post_ra>
// kernel: conv_encoder_forward.1
= control target key start
LH: loop header
LB: loop body
LE: loop exit
PB: predicated region body
PF: predicated region fallthrough
CT: control target
= control target key end

     0   :  { %14 = vsyncpa [#allocation5], 0  ;;  %s2355_s0 = inlined_call_operand.vmem [shape: f32[2,16,32], index: 0, kind: input, shape index: {}]   ;;  %s2356_s1 = inlined_call_operand.hbm [shape: f32[64,8], index: 1, kind: input, shape index: {}]   ;;  %s2357_s2 = inlined_call_operand.vmem [shape: f32[1,8], index: 2, kind: input, shape index: {}]   ;;  %s2358_s3 = inlined_call_operand.hbm [shape: f32[32,16], index: 3, kind: input, shape index: {}]   ;;  %s2359_s4 = inlined_call_operand.vmem [shape: f32[1,16], index: 4, kind: input, shape index: {}]   ;;  %s2360_s5 = inlined_call_operand.vmem [shape: f32[96,48], index: 5, kind: input, shape index: {}]   ;;  %s2361_s6 = inlined_call_operand.vmem [shape: f32[1,48], index: 6, kind: input, shape index: {}]   ;;  %s2362_s7 = inlined_call_operand.hbm [shape: f32[48,24], index: 7, kind: input, shape index: {}]   ;;  %s2363_s8 = inlined_call_operand.vmem [shape: f32[1,24], index: 8, kind: input, shape index: {}]   ;;  %s2364_s9 = inlined_call_operand.hbm [shape: f32[2,24], index: 9, kind: output, shape index: {}]  }
   0x1   :  { %15 = vsyncpa [#allocation8], 0 }
   0x2   :  { %16 = vsyncpa [#allocation6], 0  ;;  %s2063_s30 = smov [#allocation7]   ;;  %s2064_s11 = smov [#allocation4]  }
   0x3   :  { %s38_s10 = sshll.u32 %s2063_s30, 4  ;;  %s24_s12 = sshll.u32 %s2064_s11, 4  ;;  %s39_s10 = int_to_ptr.vmem [resolvable:$true] %s38_s10  ;;  %s2122_s12 = int_to_ptr.vmem [resolvable:$true] %s24_s12 }
   0x4   :  { %s1969_s15 = scalar_lea.hbm %s2358_s3, 512 }
   0x5   :  { %p1970_p0 = scmp.ne.s32.totalorder %s2358_s3, %s1969_s15  ;;  %p1973_p1 = scmp.lt.u32.totalorder %s1969_s15, %s2358_s3 }
   0x7   :  { %p1975_p2 = pnand %p1973_p1, %p1970_p0 }
   0x9   :  { %1978 = shalt.err (!%p1975_p2)
}
   0xa   :  { %s1979_s20 = scalar_lea.vmem %s39_s10, 512  ;;  %p1984_p4 = scmp.lt.s32.totalorder %s39_s10, %s39_s10 }
   0xb   :  { %p1980_p3 = scmp.ne.s32.totalorder %s39_s10, %s1979_s20  ;;  %p1985_p5 = scmp.lt.s32.totalorder %s1979_s20, %s1979_s20 }
   0xd   :  { %p1986_p6 = por %p1985_p5, %p1984_p4 }
   0xf   :  { %p1987_p7 = pnand %p1986_p6, %p1980_p3 }
  0x11   :  { %1990 = shalt.err (!%p1987_p7)
}
  0x12   :  { %s2065_s21 = smov 128   ;;  %s2066_s22 = smov 8  }
  0x13   :  { %44 = dma.hbm_to_vmem [thread:$0]  %s2358_s3, 512, %s39_s10, [#allocation8], %s2065_s21, %s2065_s21, %s2066_s22  }
  0x14   :  { %s1991_s27 = scalar_lea.hbm %s2356_s1, 1024 }
  0x15   :  { %p1992_p8 = scmp.ne.s32.totalorder %s2356_s1, %s1991_s27  ;;  %p1995_p9 = scmp.lt.u32.totalorder %s1991_s27, %s2356_s1 }
  0x17   :  { %p1997_p10 = pnand %p1995_p9, %p1992_p8 }
  0x19   :  { %2000 = shalt.err (!%p1997_p10)
}
  0x1a   :  { %s2001_s13 = scalar_lea.vmem %s2122_s12, 1024  ;;  %p2006_p12 = scmp.lt.s32.totalorder %s2122_s12, %s2122_s12 }
  0x1b   :  { %p2002_p11 = scmp.ne.s32.totalorder %s2122_s12, %s2001_s13  ;;  %p2007_p13 = scmp.lt.s32.totalorder %s2001_s13, %s2001_s13 }
  0x1d   :  { %p2008_p0 = por %p2007_p13, %p2006_p12 }
  0x1f   :  { %p2009_p1 = pnand %p2008_p0, %p2002_p11 }
  0x21   :  { %2012 = shalt.err (!%p2009_p1)
}
  0x22   :  { %30 = dma.hbm_to_vmem [thread:$0]  %s2356_s1, 1024, %s2122_s12, [#allocation5], %s2065_s21, %s2065_s21, %s2066_s22  }
  0x23   :  { %s2067_s14 = smov [#allocation9]   ;;  %s2013_s18 = scalar_lea.hbm %s2362_s7, 768 }
  0x24   :  { %s56_s15 = sshll.u32 %s2067_s14, 4  ;;  %p2014_p2 = scmp.ne.s32.totalorder %s2362_s7, %s2013_s18  ;;  %s57_s15 = int_to_ptr.vmem [resolvable:$true] %s56_s15 }
  0x25   :  { %p2017_p3 = scmp.lt.u32.totalorder %s2013_s18, %s2362_s7 }
  0x27   :  { %p2019_p4 = pnand %p2017_p3, %p2014_p2 }
  0x29   :  { %2022 = shalt.err (!%p2019_p4)
}
  0x2a   :  { %s2023_s25 = scalar_lea.vmem %s57_s15, 768  ;;  %p2028_p6 = scmp.lt.s32.totalorder %s57_s15, %s57_s15 }
  0x2b   :  { %p2024_p5 = scmp.ne.s32.totalorder %s57_s15, %s2023_s25  ;;  %p2029_p7 = scmp.lt.s32.totalorder %s2023_s25, %s2023_s25 }
  0x2d   :  { %p2030_p8 = por %p2029_p7, %p2028_p6 }
  0x2f   :  { %p2031_p9 = pnand %p2030_p8, %p2024_p5 }
  0x31   :  { %2034 = shalt.err (!%p2031_p9)
}
  0x32   :  { %62 = dma.hbm_to_vmem [thread:$0]  %s2362_s7, 768, %s57_s15, [#allocation8], %s2065_s21, %s2065_s21, %s2066_s22  }
  0x33   :  { %2057 = dma.done.wait [#allocation5], 1024  }
  0x34   :  { %2058 = vsyncadd [#allocation5], 4294966272 }
  0x35   :  { %2059 = dma.done.wait [#allocation8], 1280  }
  0x36   :  { %2060 = vsyncadd [#allocation8], 4294966016  ;;  %v80_v0 = vld [vmem:[#allocation4 + $0x20] sm:$0xff]  ;;  %v81_v1 = vld [vmem:[#allocation4 + $0x28] sm:$0xff]  ;;  %vm86_vm0 = vcmask 1046528   ;;  %vm90_vm1 = vcmask 261120  }
  0x37   :  { %v82_v2 = vld [vmem:[#allocation4 + $0x30] sm:$0xff]  ;;  %v2174_v3 = vpack.c.bf16 %v81_v1, %v80_v0  ;;  %v83_v4 = vld [vmem:[#allocation4 + $0x38] sm:$0xff]  ;;  %v74_v5 = vld [vmem:[%s2355_s0] sm:$0xff]  ;;  %v2068_v19 = vmov 0.0   ;;  %vm2069_vm2 = vmmov 0   ;;  %vm262_vm3 = vcmask 63488  }
  0x38   :  { %v75_v6 = vld [vmem:[%s2355_s0 + $0x8] sm:$0xff]  ;;  %v2182_v7 = vpack.c.bf16 %v83_v4, %v82_v2  ;;  %v87_v8 = vrot.slane %v74_v5, 1  ;;  %v76_v10 = vld [vmem:[#allocation4] sm:$0xff]  ;;  %v78_v14 = vld [vmem:[#allocation4 + $0x10] sm:$0xff]  ;;  %1783 = vmatprep.subr.mxu1 %v2068_v19  ;;  %1785 = vmatprep.mubr.msk.f32.mxu1 %vm2069_vm2, %v2068_v19  ;;  %vm260_vm4 = vcmask 64512   ;;  %vm578_vm5 = vcmask 128000  }
  0x39   :  { %v88_v9 = vrot.slane %v75_v6, 1  ;;  %v77_v11 = vld [vmem:[#allocation4 + $0x8] sm:$0xff]  ;;  %1898 = vmatprep.subr.bf16.mxu0 %v2174_v3  ;;  %v79_v15 = vld [vmem:[#allocation4 + $0x18] sm:$0xff]  ;;  %v2197_v18 = vld [vmem:[#allocation7] sm:$0xff]  ;;  %v2070_v1 = vmov 0.0|0.0   ;;  %vm1086_vm6 = vcmask 130048  }
  0x3a   :  { %1900 = vmatpush3.bf16.msra.mxu0 %v2174_v3  ;;  %v2189_v13 = vpack.c.bf16 %v77_v11, %v76_v10  ;;  %v1909_v16 = vpack.c.bf16 %v79_v15, %v78_v14  ;;  %v268_v17 = vld [vmem:[#allocation7 + $0x8] sm:$0xff]  ;;  %1784 = vmatpush3.msra.mxu1 %v2197_v18  ;;  %v2211_v20 = vld [vmem:[%s2357_s2] ss:$0 sm:$0xff]  ;;  %v2217_v27 = vld [vmem:[#allocation7 + $0x10] sm:$0xff]  ;;  %vm1567_vm7 = vcmask 392192   ;;  %vm1642_vm8 = vcmask 189440  }
  0x3b   :  { %v89_v12 = vsel %vm86_vm0, %v87_v8, %v88_v9  ;;  %1902 = vmatprep.subr.bf16.mxu0 %v2182_v7  ;;  %1788 = vmatprep.subr.mxu1 %v2068_v19  ;;  %v1670_v28 = vld [vmem:[%s2355_s0 + $0x10] sm:$0xff]  ;;  %v1671_v29 = vld [vmem:[%s2355_s0 + $0x18] sm:$0xff]  ;;  %v1669_v47 = vld [vmem:[%s2359_s4] ss:$0 sm:$0xff]  ;;  %s2071_s4 = smov [#allocation10]  }
  0x3c   :  { %1764 = vmatprep.mubr.msk.f32.mxu0 %vm90_vm1, %v89_v12  ;;  %v494_v32 = vld [vmem:[#allocation7 + $0x18] sm:$0xff]  ;;  %v593_v33 = vrot.slane %v1670_v28, 1  ;;  %v594_v34 = vrot.slane %v1671_v29, 1  ;;  %v1084_v62 = vld [vmem:[%s2360_s5 + $0x10] sm:$0xff]  ;;  %v1080_v0 = vld [vmem:[%s2360_s5] sm:$0xff]  ;;  %s1650_s3 = sshll.u32 %s2071_s4, 4  ;;  %s1651_s3 = int_to_ptr.vmem [resolvable:$true] %s1650_s3 }
  0x3d   :  { %v1085_v63 = vld [vmem:[%s2360_s5 + $0x18] sm:$0xff]  ;;  %s2035_s10 = scalar_lea.vmem %s1651_s3, 32  ;;  %p2040_p11 = scmp.lt.s32.totalorder %s1651_s3, %s1651_s3 }
  0x3e   :  { %1904 = vmatpush3.bf16.msra.mxu0 %v2182_v7  ;;  %v595_v36 = vsel %vm86_vm0, %v593_v33, %v594_v34  ;;  %v1930_v2 = vpack.c.bf16 %v1085_v63, %v1084_v62  ;;  %p2036_p10 = scmp.ne.s32.totalorder %s1651_s3, %s2035_s10  ;;  %p2041_p12 = scmp.lt.s32.totalorder %s2035_s10, %s2035_s10 }
  0x3f   :  { %1906 = vmatprep.subr.bf16.mxu0 %v2189_v13 }
  0x40   :  { %p2042_p13 = por %p2041_p12, %p2040_p11 }
  0x41   :  { %1765 = vmatmul.mubr.msk.f32.vlgmr.msra.gmra.mrb[0].mxu0 %vm90_vm1, %v88_v9 }
  0x42   :  { %1908 = vmatpush3.bf16.msra.mxu0 %v2189_v13  ;;  %1775 = vmatprep.mubr.msk.f32.mxu0 %vm90_vm1, %v74_v5  ;;  %p2043_p0 = pnand %p2042_p13, %p2036_p10 }
  0x43   :  { %1910 = vmatprep.subr.bf16.mxu0 %v1909_v16 }
  0x46   :  { %1912 = vmatpush3.bf16.msra.mxu0 %v1909_v16 }
  0x47   :  { %1778 = vmatprep.subr.mxu0 %v2068_v19 }
  0x49   :  { %1776 = vmatmul.mubr.msk.f32.vlgmr.msra.gmra.mrb[0].mxu0 %vm90_vm1, %v75_v6 }
  0x4a   :  { %1779 = vmatpush3.msra.mxu0 %v268_v17  ;;  %1780 = vmatprep.mubr.msk.f32.mxu0 %vm2069_vm2, %v2068_v19 }
  0x4b   :  { %1820 = vmatprep.subr.mxu0 %v2068_v19 }
 0x11c   :  { %v1777_v21 = vpop.f32.mrb[0].mxu0 }
 0x11d   :  { %v257_v22 = vadd.f32 %v1777_v21, %v2211_v20  ;;  %v240_v23 = vpop.f32.mrb[1].mxu0  ;;  %v1313_v21 = vld [vmem:[%s2360_s5 + $0x30] sm:$0xff] }
 0x11e   :  { %v256_v24 = vadd.f32 %v2211_v20, %v240_v23 }
 0x11f   :  { %v259_v25 = vmax.f32 %v257_v22, 0.0  ;;  %v1314_v22 = vld [vmem:[%s2360_s5 + $0x38] sm:$0xff] }
 0x120   :  { %v258_v26 = vmax.f32 %v256_v24, 0.0  ;;  %v1939_v24 = vpack.c.bf16 %v1314_v22, %v1313_v21 }
 0x121   :  { %263 = vst.msk [vmem:[#allocation2 + $0x8] sm:$0x7f] %vm262_vm3, %v259_v25  ;;  %v1391_v25 = vld [vmem:[%s2360_s5 + $0x40] sm:$0xff] }
 0x122   :  { %261 = vst.msk [vmem:[#allocation2] sm:$0xff] %vm260_vm4, %v258_v26  ;;  %v1392_v26 = vld [vmem:[%s2360_s5 + $0x48] sm:$0xff] }
 0x129   :  { %v267_v30 = vld [vmem:[#allocation2 + $0x1] ss:$2 sm:$0x3f]  ;;  %v264_v31 = vld [vmem:[#allocation2] ss:$2 sm:$0x3f] }
 0x12a   :  { %1781 = vmatmul.mubr.msk.f32.vlgmr.msra.gmra.mrb[2].mxu0 %vm260_vm4, %v267_v30  ;;  %1786 = vmatmul.mubr.msk.f32.vlgmr.msra.gmra.mrb[0].mxu1 %vm260_vm4, %v264_v31  ;;  %v416_v35 = vld [vmem:[#allocation2 + $0x2] ss:$2 sm:$0x3f]  ;;  %v493_v37 = vld [vmem:[#allocation2 + $0x3] ss:$2 sm:$0x3f]  ;;  %v1942_v31 = vpack.c.bf16 %v1392_v26, %v1391_v25 }
 0x12b   :  { %1789 = vmatpush3.msra.mxu1 %v2217_v27  ;;  %1790 = vmatprep.mubr.msk.f32.mxu1 %vm2069_vm2, %v2068_v19 }
 0x12c   :  { %1793 = vmatprep.subr.mxu1 %v2068_v19  ;;  %1821 = vmatpush3.msra.mxu0 %v268_v17 }
 0x12d   :  { %1822 = vmatprep.mubr.msk.f32.mxu0 %vm2069_vm2, %v2068_v19  ;;  %1825 = vmatprep.subr.mxu0 %v2068_v19 }
 0x12e   :  { %1791 = vmatmul.mubr.msk.f32.vlgmr.msra.gmra.mrb[2].mxu1 %vm260_vm4, %v416_v35 }
 0x12f   :  { %1794 = vmatpush3.msra.mxu1 %v494_v32  ;;  %1795 = vmatprep.mubr.msk.f32.mxu1 %vm2069_vm2, %v2068_v19 }
 0x130   :  { %1914 = vmatprep.subr.bf16.mxu1 %v2174_v3 }
 0x132   :  { %1796 = vmatmul.mubr.msk.f32.vlgmr.msra.gmra.mrb[4].mxu1 %vm260_vm4, %v493_v37  ;;  %v1554_v37 = vld [vmem:[#allocation9] sm:$0xff] }
 0x133   :  { %1916 = vmatpush3.bf16.msra.mxu1 %v2174_v3  ;;  %1806 = vmatprep.mubr.msk.f32.mxu1 %vm90_vm1, %v595_v36  ;;  %v1081_v3 = vld [vmem:[%s2360_s5 + $0x8] sm:$0xff] }
 0x134   :  { %1918 = vmatprep.subr.bf16.mxu1 %v2182_v7  ;;  %v1933_v4 = vpack.c.bf16 %v1081_v3, %v1080_v0 }
 0x137   :  { %1920 = vmatpush3.bf16.msra.mxu1 %v2182_v7 }
 0x138   :  { %1922 = vmatprep.subr.bf16.mxu1 %v2189_v13 }
 0x13a   :  { %1807 = vmatmul.mubr.msk.f32.vlgmr.msra.gmra.mrb[6].mxu1 %vm90_vm1, %v594_v34 }
 0x13b   :  { %1924 = vmatpush3.bf16.msra.mxu1 %v2189_v13  ;;  %1817 = vmatprep.mubr.msk.f32.mxu1 %vm90_vm1, %v1670_v28  ;;  %v1470_v28 = vld [vmem:[%s2360_s5 + $0x58] sm:$0xff] }
 0x13c   :  { %1926 = vmatprep.subr.bf16.mxu1 %v1909_v16 }
 0x13f   :  { %1928 = vmatpush3.bf16.msra.mxu1 %v1909_v16 }
 0x140   :  { %1929 = vmatprep.subr.bf16.mxu1 %v2070_v1 }
 0x142   :  { %1818 = vmatmul.mubr.msk.f32.vlgmr.msra.gmra.mrb[6].mxu1 %vm90_vm1, %v1671_v29 }
 0x143   :  { %1844 = vmatprep.mubr.msk.f32.mxu1 %vm2069_vm2, %v2068_v19  ;;  %1931 = vmatpush3.bf16.msra.mxu1 %v1930_v2 }
 0x144   :  { %1935 = vmatprep.subr.bf16.mxu1 %v2070_v1 }
 0x1fd   :  { %v338_v38 = vpop.f32.mrb[2].mxu0  ;;  %v411_v39 = vpop.f32.mrb[0].mxu1 }
 0x1fe   :  { %v412_v40 = vadd.f32 %v411_v39, %v338_v38  ;;  %v1782_v41 = vpop.f32.mrb[3].mxu0  ;;  %v1787_v42 = vpop.f32.mrb[1].mxu1  ;;  %v1555_v38 = vld [vmem:[#allocation9 + $0x8] sm:$0xff] }
 0x1ff   :  { %v1948_v39 = vpack.c.bf16 %v1555_v38, %v1554_v37  ;;  %v1557_v41 = vld [vmem:[#allocation9 + $0x18] sm:$0xff] }
 0x201   :  { %v487_v43 = vpop.f32.mrb[2].mxu1 }
 0x202   :  { %v491_v44 = vadd.f32 %v487_v43, %v412_v40  ;;  %v1792_v45 = vpop.f32.mrb[3].mxu1  ;;  %v1556_v40 = vld [vmem:[#allocation9 + $0x10] sm:$0xff]  ;;  %v1558_v43 = vld [vmem:[#allocation9 + $0x20] sm:$0xff] }
 0x203   :  { %v1951_v42 = vpack.c.bf16 %v1557_v41, %v1556_v40 }
 0x205   :  { %v564_v46 = vpop.f32.mrb[4].mxu1 }
 0x206   :  { %v568_v48 = vadd.f32 %v564_v46, %v491_v44  ;;  %v1797_v49 = vpop.f32.mrb[5].mxu1  ;;  %v1559_v44 = vld [vmem:[#allocation9 + $0x28] sm:$0xff] }
 0x207   :  { %v1954_v45 = vpack.c.bf16 %v1559_v44, %v1558_v43 }
 0x208   :  { %v576_v50 = vadd.f32 %v1669_v47, %v568_v48 }
 0x20a   :  { %v577_v51 = vmax.f32 %v576_v50, 0.0 }
 0x20c   :  { %579 = vst.msk [vmem:[#allocation3] sm:$0x3f] %vm578_vm5, %v577_v51 }
 0x215   :  { %v1819_v52 = vpop.f32.mrb[6].mxu1 }
 0x216   :  { %v762_v53 = vadd.f32 %v1819_v52, %v2211_v20  ;;  %v745_v54 = vpop.f32.mrb[7].mxu1 }
 0x217   :  { %v761_v55 = vadd.f32 %v2211_v20, %v745_v54  ;;  %v1236_v20 = vld [vmem:[%s2360_s5 + $0x28] sm:$0xff] }
 0x218   :  { %v764_v56 = vmax.f32 %v762_v53, 0.0 }
 0x219   :  { %v763_v57 = vmax.f32 %v761_v55, 0.0 }
 0x21a   :  { %766 = vst.msk [vmem:[#allocation2 + $0x8] sm:$0x7f] %vm262_vm3, %v764_v56 }
 0x21b   :  { %765 = vst.msk [vmem:[#allocation2] sm:$0xff] %vm260_vm4, %v763_v57 }
 0x222   :  { %v769_v58 = vld [vmem:[#allocation2 + $0x1] ss:$2 sm:$0x3f]  ;;  %v767_v59 = vld [vmem:[#allocation2] ss:$2 sm:$0x3f] }
 0x223   :  { %1823 = vmatmul.mubr.msk.f32.vlgmr.msra.gmra.mrb[4].mxu0 %vm260_vm4, %v769_v58  ;;  %v917_v60 = vld [vmem:[#allocation2 + $0x2] ss:$2 sm:$0x3f]  ;;  %v993_v61 = vld [vmem:[#allocation2 + $0x3] ss:$2 sm:$0x3f] }
 0x224   :  { %1826 = vmatpush3.msra.mxu0 %v2197_v18  ;;  %1827 = vmatprep.mubr.msk.f32.mxu0 %vm2069_vm2, %v2068_v19  ;;  %v1235_v18 = vld [vmem:[%s2360_s5 + $0x20] sm:$0xff] }
 0x225   :  { %1830 = vmatprep.subr.mxu0 %v2068_v19  ;;  %v1936_v23 = vpack.c.bf16 %v1236_v20, %v1235_v18 }
 0x227   :  { %1828 = vmatmul.mubr.msk.f32.vlgmr.msra.gmra.mrb[6].mxu0 %vm260_vm4, %v767_v59 }
 0x228   :  { %1831 = vmatpush3.msra.mxu0 %v2217_v27  ;;  %1832 = vmatprep.mubr.msk.f32.mxu0 %vm2069_vm2, %v2068_v19  ;;  %v1469_v27 = vld [vmem:[%s2360_s5 + $0x50] sm:$0xff] }
 0x229   :  { %1835 = vmatprep.subr.mxu0 %v2068_v19 }
 0x22b   :  { %1833 = vmatmul.mubr.msk.f32.vlgmr.msra.gmra.mrb[8].mxu0 %vm260_vm4, %v917_v60 }
 0x22c   :  { %1836 = vmatpush3.msra.mxu0 %v494_v32  ;;  %1837 = vmatprep.mubr.msk.f32.mxu0 %vm2069_vm2, %v2068_v19  ;;  %v1945_v32 = vpack.c.bf16 %v1470_v28, %v1469_v27 }
 0x22d   :  { %1932 = vmatprep.subr.bf16.mxu0 %v2070_v1 }
 0x22f   :  { %1838 = vmatmul.mubr.msk.f32.vlgmr.msra.gmra.mrb[10].mxu0 %vm260_vm4, %v993_v61  ;;  %v1688_v61 = vld [vmem:[%s2361_s6] ss:$0 sm:$0xff] }
 0x230   :  { %1851 = vmatprep.mubr.msk.f32.mxu0 %vm2069_vm2, %v2068_v19  ;;  %1934 = vmatpush3.bf16.msra.mxu0 %v1933_v4 }
 0x231   :  { %1938 = vmatprep.subr.bf16.mxu0 %v2070_v1 }
 0x2f6   :  { %v840_v5 = vpop.f32.mrb[4].mxu0 }
 0x2f7   :  { %v1824_v6 = vpop.f32.mrb[5].mxu0 }
 0x2fa   :  { %v913_v7 = vpop.f32.mrb[6].mxu0 }
 0x2fb   :  { %v914_v8 = vadd.f32 %v913_v7, %v840_v5  ;;  %v1829_v9 = vpop.f32.mrb[7].mxu0 }
 0x2fe   :  { %v988_v10 = vpop.f32.mrb[8].mxu0 }
 0x2ff   :  { %v992_v11 = vadd.f32 %v988_v10, %v914_v8  ;;  %v1834_v12 = vpop.f32.mrb[9].mxu0 }
 0x302   :  { %v1064_v13 = vpop.f32.mrb[10].mxu0 }
 0x303   :  { %v1068_v14 = vadd.f32 %v1064_v13, %v992_v11  ;;  %v1839_v15 = vpop.f32.mrb[11].mxu0 }
 0x305   :  { %v1076_v16 = vadd.f32 %v1669_v47, %v1068_v14 }
 0x307   :  { %v1077_v17 = vmax.f32 %v1076_v16, 0.0 }
 0x309   :  { %1078 = vst.msk [vmem:[#allocation3 + $0x6] sm:$0x3f] %vm578_vm5, %v1077_v17 }
 0x310   :  { %v1083_v29 = vld [vmem:[#allocation3 + $0x1] ss:$6 sm:$0x3]  ;;  %v1079_v30 = vld [vmem:[#allocation3] ss:$6 sm:$0x3] }
 0x311   :  { %1845 = vmatmul.mubr.msk.f32.vlgmr.msra.gmra.mrb[8].mxu1 %vm1086_vm6, %v1083_v29  ;;  %1852 = vmatmul.mubr.msk.f32.vlgmr.msra.gmra.mrb[12].mxu0 %vm1086_vm6, %v1079_v30  ;;  %v1234_v33 = vld [vmem:[#allocation3 + $0x2] ss:$6 sm:$0x3]  ;;  %v1312_v34 = vld [vmem:[#allocation3 + $0x3] ss:$6 sm:$0x3] }
 0x312   :  { %1937 = vmatpush3.bf16.msra.mxu1 %v1936_v23  ;;  %1940 = vmatpush3.bf16.msra.mxu0 %v1939_v24  ;;  %v1390_v35 = vld [vmem:[#allocation3 + $0x4] ss:$6 sm:$0x3]  ;;  %v1468_v36 = vld [vmem:[#allocation3 + $0x5] ss:$6 sm:$0x3] }
 0x313   :  { %1858 = vmatprep.mubr.msk.f32.mxu1 %vm2069_vm2, %v2068_v19  ;;  %1865 = vmatprep.mubr.msk.f32.mxu0 %vm2069_vm2, %v2068_v19 }
 0x314   :  { %1941 = vmatprep.subr.bf16.mxu1 %v2070_v1  ;;  %1944 = vmatprep.subr.bf16.mxu0 %v2070_v1 }
 0x315   :  { %1859 = vmatmul.mubr.msk.f32.vlgmr.msra.gmra.mrb[10].mxu1 %vm1086_vm6, %v1234_v33  ;;  %1866 = vmatmul.mubr.msk.f32.vlgmr.msra.gmra.mrb[14].mxu0 %vm1086_vm6, %v1312_v34 }
 0x316   :  { %1943 = vmatpush3.bf16.msra.mxu1 %v1942_v31  ;;  %1946 = vmatpush3.bf16.msra.mxu0 %v1945_v32 }
 0x317   :  { %1872 = vmatprep.mubr.msk.f32.mxu1 %vm2069_vm2, %v2068_v19  ;;  %1879 = vmatprep.mubr.msk.f32.mxu0 %vm2069_vm2, %v2068_v19 }
 0x318   :  { %1947 = vmatprep.subr.bf16.mxu1 %v2070_v1 }
 0x319   :  { %1873 = vmatmul.mubr.msk.f32.vlgmr.msra.gmra.mrb[12].mxu1 %vm1086_vm6, %v1390_v35  ;;  %1880 = vmatmul.mubr.msk.f32.vlgmr.msra.gmra.mrb[16].mxu0 %vm1086_vm6, %v1468_v36 }
 0x31a   :  { %1894 = vmatprep.mubr.msk.f32.mxu1 %vm2069_vm2, %v2068_v19  ;;  %1949 = vmatpush3.bf16.msra.mxu1 %v1948_v39 }
 0x31b   :  { %1950 = vmatprep.subr.bf16.mxu1 %v2070_v1 }
 0x31e   :  { %1952 = vmatpush3.bf16.msra.mxu1 %v1951_v42 }
 0x31f   :  { %1953 = vmatprep.subr.bf16.mxu1 %v2070_v1  ;;  %v1689_v1 = vld [vmem:[%s2363_s8] ss:$0 sm:$0xff] }
 0x322   :  { %1955 = vmatpush3.bf16.msra.mxu1 %v1954_v45 }
 0x3e4   :  { %v1156_v46 = vpop.f32.mrb[8].mxu1  ;;  %v1229_v47 = vpop.f32.mrb[12].mxu0 }
 0x3e5   :  { %v1230_v48 = vadd.f32 %v1229_v47, %v1156_v46  ;;  %v1846_v19 = vpop.f32.mrb[9].mxu1  ;;  %v1853_v49 = vpop.f32.mrb[13].mxu0 }
 0x3e8   :  { %v1306_v50 = vpop.f32.mrb[10].mxu1  ;;  %v1384_v51 = vpop.f32.mrb[14].mxu0 }
 0x3e9   :  { %v1310_v52 = vadd.f32 %v1306_v50, %v1230_v48  ;;  %v1860_v53 = vpop.f32.mrb[11].mxu1  ;;  %v1867_v54 = vpop.f32.mrb[15].mxu0 }
 0x3eb   :  { %v1388_v55 = vadd.f32 %v1384_v51, %v1310_v52 }
 0x3ec   :  { %v1462_v56 = vpop.f32.mrb[12].mxu1  ;;  %v1540_v57 = vpop.f32.mrb[16].mxu0 }
 0x3ed   :  { %v1466_v58 = vadd.f32 %v1462_v56, %v1388_v55  ;;  %v1874_v59 = vpop.f32.mrb[13].mxu1  ;;  %v1881_v60 = vpop.f32.mrb[17].mxu0 }
 0x3ef   :  { %v1544_v62 = vadd.f32 %v1540_v57, %v1466_v58 }
 0x3f1   :  { %v1552_v63 = vadd.f32 %v1688_v61, %v1544_v62 }
 0x3f3   :  { %v1553_v0 = vmax.f32 %v1552_v63, 0.0 }
 0x3f5   :  { %1895 = vmatmul.mubr.msk.f32.vlgmr.msra.gmra.mrb[14].mxu1 %vm1567_vm7, %v1553_v0 }
 0x4c8   :  { %v1637_v2 = vpop.f32.mrb[14].mxu1 }
 0x4c9   :  { %v1638_v3 = vadd.f32 %v1689_v1, %v1637_v2  ;;  %v1896_v4 = vpop.f32.mrb[15].mxu1 }
 0x4cb   :  { %v1641_v5 = vmax.f32 %v1638_v3, 0.0 }
 0x4cd   :  { %1643 = vst.msk [vmem:[#allocation10] sm:$0x3] %vm1642_vm8, %v1641_v5 }
 0x4ce   :  { %2046 = shalt.err (!%p2043_p0)
}
 0x4cf   :  { %s2047_s8 = scalar_lea.hbm %s2364_s9, 32 }
 0x4d0   :  { %p2048_p1 = scmp.ne.s32.totalorder %s2364_s9, %s2047_s8  ;;  %p2051_p2 = scmp.lt.u32.totalorder %s2047_s8, %s2364_s9 }
 0x4d2   :  { %p2053_p3 = pnand %p2051_p2, %p2048_p1 }
 0x4d4   :  { %2056 = shalt.err (!%p2053_p3)
}
 0x4d5   :  { %1653 = dma.vmem_to_hbm [thread:$0]  %s1651_s3, 32, %s2364_s9, [#allocation6]  }
 0x4d6   :  { %2061 = dma.done.wait [#allocation6], 32  }
 0x4d7   :  { %2062 = vsyncadd [#allocation6], 4294967264 }
 0x4d8   :  { %1657 = vsyncpa [#allocation5], 1 }
 0x4d9   :  { %1658 = vsyncpa [#allocation8], 1 }
 0x4da   :  { %1659 = vsyncpa [#allocation6], 1 }

</bundles_post_ra>
